<compile_context>
chip_gen: v6e
topology: v6e:2x2x1
jax: 0.10.0
libtpu: 0.0.40
codegen_flags: <defaults>
</compile_context>

<pallas_src>
import functools

import jax
import jax.numpy as jnp
from jax.experimental import pallas as pl
from jax.experimental.pallas import tpu as pltpu


def rnn_fc_kernel(x_ref,       # (T*B, D)  time-major, flattened in the wrapper
                  wih0_ref,    # (D, H)    layer-0 input weights (pre-transposed)
                  whh0_ref,    # (H, H)    layer-0 recurrent weights
                  wih1_ref,    # (H, H)    layer-1 input weights
                  whh1_ref,    # (H, H)    layer-1 recurrent weights
                  b0_ref,      # (1, H)  = bih0 + bhh0
                  b1_ref,      # (1, H)  = bih1 + bhh1
                  wfc_ref,     # (H, O)    final linear weights (pre-transposed)
                  bfc_ref,     # (1, O)
                  out_ref,     # (B, O)
                  *, batch, matmul_dtype):
    f32 = jnp.float32
    TB, _ = x_ref.shape
    B = batch
    T = TB // B
    H = whh0_ref.shape[0]

    # ---- Hoisted layer-0 input projection: one big (T*B, D)@(D, H) matmul ----
    # Combined layer-0 bias folded in; removes half of layer-0's MXU work and all
    # of its bias adds from the serial recurrence chain.
    xw0 = (jnp.dot(x_ref[...], wih0_ref[...], preferred_element_type=f32)
           + b0_ref[...])                                   # (T*B, H), f32

    # Weights loaded and bias broadcast ONCE, outside the unrolled loop
    # (JAX does not CSE broadcast_in_dim).
    whh0 = whh0_ref[...]
    wih1 = wih1_ref[...]
    whh1 = whh1_ref[...]
    b1 = jnp.broadcast_to(b1_ref[...], (B, H)).astype(f32)

    md = matmul_dtype  # .astype(md) is a no-op when md == f32

    # ---- Step 0: initial hidden state is zero, skip the zero-matmuls ---------
    h0 = jnp.maximum(xw0[0:B, :], 0.0)                                      # (B, H) f32
    h1 = jnp.maximum(
        jnp.dot(h0.astype(md), wih1, preferred_element_type=f32) + b1, 0.0)

    # ---- Time recurrence, fully unrolled (T is small & static) --------------
    # Per step, the dependence structure is:
    #   r1  = h1_{t-1} @ Whh1 + b1          (independent of this step's h0)
    #   h0  = relu(xw0_t + h0_{t-1} @ Whh0) (layer-0 chain)
    #   h1  = relu(h0 @ Wih1 + r1)          (ONE matmul after h0 is ready)
    # r1 and the layer-0 matmul have no mutual dependence, so the scheduler can
    # co-issue them on the MXU; no lane concat sits between dependent matmuls.
    for t in range(1, T):
        r1 = jnp.dot(h1.astype(md), whh1, preferred_element_type=f32) + b1
        h0 = jnp.maximum(
            xw0[t * B:(t + 1) * B, :]
            + jnp.dot(h0.astype(md), whh0, preferred_element_type=f32), 0.0)
        h1 = jnp.maximum(
            jnp.dot(h0.astype(md), wih1, preferred_element_type=f32) + r1, 0.0)

    # fc(out[:, -1, :]) == fc(h1 at the last timestep)
    out_ref[...] = (
        jnp.dot(h1.astype(md), wfc_ref[...], preferred_element_type=f32)
        + bfc_ref[...]
    ).astype(out_ref.dtype)


def pack_params(params, matmul_dtype=jnp.float32):
    """One-time weight packing (hoisted out of the per-call forward path).

    Pre-transposes all weights to (in, out) so the kernel computes h @ W on the
    MXU, fuses the per-layer biases (b_ih + b_hh), keeps biases 2-D, and applies
    the matmul dtype cast (f32 by default; bf16 is a drop-in win on v6e/v7x).
    """
    (wih0, whh0, bih0, bhh0,
     wih1, whh1, bih1, bhh1,
     wfc, bfc) = params
    f32 = jnp.float32
    md = matmul_dtype
    return (
        wih0.T.astype(md),                        # (D, H)
        whh0.T.astype(md),                        # (H, H)
        wih1.T.astype(md),                        # (H, H)
        whh1.T.astype(md),                        # (H, H)
        (bih0 + bhh0)[None, :].astype(f32),       # (1, H)  epilogue stays f32
        (bih1 + bhh1)[None, :].astype(f32),       # (1, H)
        wfc.T.astype(md),                         # (H, O)
        bfc[None, :].astype(f32),                 # (1, O)
    )


def rnn_model_forward(x, packed, matmul_dtype=jnp.float32):
    """x: (B, T, D) batch-first, like the PyTorch module. Returns (B, O) f32."""
    B, T, D = x.shape
    H = packed[1].shape[0]
    O = packed[6].shape[1]

    # Only per-call layout work left in the hot path: time-major flatten of x.
    x_flat = jnp.transpose(x, (1, 0, 2)).reshape(T * B, D).astype(matmul_dtype)

    kernel = functools.partial(rnn_fc_kernel, batch=B, matmul_dtype=matmul_dtype)
    vmem = pl.BlockSpec(memory_space=pltpu.MemorySpace.VMEM)
    return pl.pallas_call(
        kernel,
        out_shape=jax.ShapeDtypeStruct((B, O), jnp.float32),
        in_specs=[vmem] * (1 + len(packed)),
        out_specs=vmem,
    )(x_flat, *packed)


def rnn_model_reference(x, params):
    """Pure-JAX reference reproducing nn.RNN(relu, 2 layers) + fc(last step)."""
    (wih0, whh0, bih0, bhh0,
     wih1, whh1, bih1, bhh1,
     wfc, bfc) = params
    B, T, _ = x.shape
    H = whh0.shape[0]
    h0 = jnp.zeros((B, H), jnp.float32)
    h1 = jnp.zeros((B, H), jnp.float32)
    for t in range(T):
        x_t = x[:, t, :]
        h0 = jnp.maximum(x_t @ wih0.T + bih0 + h0 @ whh0.T + bhh0, 0.0)
        h1 = jnp.maximum(h0 @ wih1.T + bih1 + h1 @ whh1.T + bhh1, 0.0)
    return h1 @ wfc.T + bfc


def init_params(key, input_dim, hidden_dim, output_dim):
    """Deterministic init mimicking PyTorch's U(-1/sqrt(H), 1/sqrt(H))."""
    ks = jax.random.split(key, 10)
    s = 1.0 / jnp.sqrt(hidden_dim)
    u = lambda k, shape: jax.random.uniform(k, shape, jnp.float32, -s, s)
    wih0 = u(ks[0], (hidden_dim, input_dim))
    whh0 = u(ks[1], (hidden_dim, hidden_dim))
    bih0 = u(ks[2], (hidden_dim,))
    bhh0 = u(ks[3], (hidden_dim,))
    wih1 = u(ks[4], (hidden_dim, hidden_dim))
    whh1 = u(ks[5], (hidden_dim, hidden_dim))
    bih1 = u(ks[6], (hidden_dim,))
    bhh1 = u(ks[7], (hidden_dim,))
    wfc = u(ks[8], (output_dim, hidden_dim))
    bfc = u(ks[9], (output_dim,))
    return (wih0, whh0, bih0, bhh0, wih1, whh1, bih1, bhh1, wfc, bfc)


if __name__ == "__main__":
    # Small shapes consistent with RNNModel(input_dim, hidden_dim, layer_dim=2, output_dim)
    B, T = 8, 8
    INPUT_DIM, HIDDEN_DIM, OUTPUT_DIM = 32, 32, 16

    key = jax.random.PRNGKey(0)
    kx, kp = jax.random.split(key)
    x = jax.random.normal(kx, (B, T, INPUT_DIM), jnp.float32)
    params = init_params(kp, INPUT_DIM, HIDDEN_DIM, OUTPUT_DIM)

    # One-time weight packing (not on the per-call hot path).
    # On v6e/v7x, pack_params(params, jnp.bfloat16) + matmul_dtype=jnp.bfloat16
    # in the forward is a drop-in latency win; f32 kept here for exact parity.
    packed = pack_params(params, matmul_dtype=jnp.float32)
    packed = jax.tree_util.tree_map(jax.block_until_ready, packed)

    out = rnn_model_forward(x, packed, matmul_dtype=jnp.float32)
    out = jax.block_until_ready(out)

    ref = rnn_model_reference(x, params)
    assert out.shape == (B, OUTPUT_DIM)
    # Tolerance allows for MXU default-precision / reassociation differences
    # introduced by the fused-bias / hoisted-projection formulation.
    assert jnp.allclose(out, ref, atol=5e-3, rtol=5e-3), "mismatch vs reference"

    print("KERNEL_OK")
</pallas_src>

<mosaic_0001>
module attributes {stable_mosaic.version = 11 : i64} {
  func.func @rnn_fc_kernel(%arg0: memref<64x32xf32, #tpu.memory_space<vmem>>, %arg1: memref<32x32xf32, #tpu.memory_space<vmem>>, %arg2: memref<32x32xf32, #tpu.memory_space<vmem>>, %arg3: memref<32x32xf32, #tpu.memory_space<vmem>>, %arg4: memref<32x32xf32, #tpu.memory_space<vmem>>, %arg5: memref<1x32xf32, #tpu.memory_space<vmem>>, %arg6: memref<1x32xf32, #tpu.memory_space<vmem>>, %arg7: memref<32x16xf32, #tpu.memory_space<vmem>>, %arg8: memref<1x16xf32, #tpu.memory_space<vmem>>, %arg9: memref<8x16xf32, #tpu.memory_space<vmem>>) attributes {dimension_semantics = [], scalar_prefetch = 0 : i64, scratch_operands = 0 : i64, tpu.core_type = #tpu.core_type<tc>} {
    %c0 = arith.constant 0 : index
    %c0_0 = arith.constant 0 : index
    %0 = vector.load %arg0[%c0, %c0_0] : memref<64x32xf32, #tpu.memory_space<vmem>>, vector<64x32xf32>
    %c0_1 = arith.constant 0 : index
    %c0_2 = arith.constant 0 : index
    %1 = vector.load %arg1[%c0_1, %c0_2] : memref<32x32xf32, #tpu.memory_space<vmem>>, vector<32x32xf32>
    %cst = arith.constant dense<0.000000e+00> : vector<64x32xf32>
    %2 = tpu.matmul %0, %1, %cst {dimension_numbers = #tpu.dot_dimension_numbers<[1], [0], [0], [1], [0, 0, 1, 1], [], []>} : vector<64x32xf32>, vector<32x32xf32>, vector<64x32xf32> -> vector<64x32xf32>
    %c0_3 = arith.constant 0 : index
    %c0_4 = arith.constant 0 : index
    %3 = vector.load %arg5[%c0_3, %c0_4] : memref<1x32xf32, #tpu.memory_space<vmem>>, vector<1x32xf32>
    %4 = vector.broadcast %3 : vector<1x32xf32> to vector<64x32xf32>
    %5 = arith.addf %2, %4 : vector<64x32xf32>
    %c0_5 = arith.constant 0 : index
    %c0_6 = arith.constant 0 : index
    %6 = vector.load %arg2[%c0_5, %c0_6] : memref<32x32xf32, #tpu.memory_space<vmem>>, vector<32x32xf32>
    %c0_7 = arith.constant 0 : index
    %c0_8 = arith.constant 0 : index
    %7 = vector.load %arg3[%c0_7, %c0_8] : memref<32x32xf32, #tpu.memory_space<vmem>>, vector<32x32xf32>
    %c0_9 = arith.constant 0 : index
    %c0_10 = arith.constant 0 : index
    %8 = vector.load %arg4[%c0_9, %c0_10] : memref<32x32xf32, #tpu.memory_space<vmem>>, vector<32x32xf32>
    %c0_11 = arith.constant 0 : index
    %c0_12 = arith.constant 0 : index
    %9 = vector.load %arg6[%c0_11, %c0_12] : memref<1x32xf32, #tpu.memory_space<vmem>>, vector<1x32xf32>
    %10 = vector.shape_cast %9 : vector<1x32xf32> to vector<1x32xf32>
    %11 = vector.broadcast %10 : vector<1x32xf32> to vector<8x32xf32>
    %12 = vector.extract_strided_slice %5 {offsets = [0, 0], sizes = [8, 32], strides = [1, 1]} : vector<64x32xf32> to vector<8x32xf32>
    %cst_13 = arith.constant 0.000000e+00 : f32
    %13 = vector.broadcast %cst_13 : f32 to vector<8x32xf32>
    %14 = arith.maximumf %12, %13 : vector<8x32xf32>
    %cst_14 = arith.constant dense<0.000000e+00> : vector<8x32xf32>
    %15 = tpu.matmul %14, %7, %cst_14 {dimension_numbers = #tpu.dot_dimension_numbers<[1], [0], [0], [1], [0, 0, 1, 1], [], []>} : vector<8x32xf32>, vector<32x32xf32>, vector<8x32xf32> -> vector<8x32xf32>
    %16 = arith.addf %15, %11 : vector<8x32xf32>
    %cst_15 = arith.constant 0.000000e+00 : f32
    %17 = vector.broadcast %cst_15 : f32 to vector<8x32xf32>
    %18 = arith.maximumf %16, %17 : vector<8x32xf32>
    %cst_16 = arith.constant dense<0.000000e+00> : vector<8x32xf32>
    %19 = tpu.matmul %18, %8, %cst_16 {dimension_numbers = #tpu.dot_dimension_numbers<[1], [0], [0], [1], [0, 0, 1, 1], [], []>} : vector<8x32xf32>, vector<32x32xf32>, vector<8x32xf32> -> vector<8x32xf32>
    %20 = arith.addf %19, %11 : vector<8x32xf32>
    %21 = vector.extract_strided_slice %5 {offsets = [8, 0], sizes = [8, 32], strides = [1, 1]} : vector<64x32xf32> to vector<8x32xf32>
    %cst_17 = arith.constant dense<0.000000e+00> : vector<8x32xf32>
    %22 = tpu.matmul %14, %6, %cst_17 {dimension_numbers = #tpu.dot_dimension_numbers<[1], [0], [0], [1], [0, 0, 1, 1], [], []>} : vector<8x32xf32>, vector<32x32xf32>, vector<8x32xf32> -> vector<8x32xf32>
    %23 = arith.addf %21, %22 : vector<8x32xf32>
    %cst_18 = arith.constant 0.000000e+00 : f32
    %24 = vector.broadcast %cst_18 : f32 to vector<8x32xf32>
    %25 = arith.maximumf %23, %24 : vector<8x32xf32>
    %cst_19 = arith.constant dense<0.000000e+00> : vector<8x32xf32>
    %26 = tpu.matmul %25, %7, %cst_19 {dimension_numbers = #tpu.dot_dimension_numbers<[1], [0], [0], [1], [0, 0, 1, 1], [], []>} : vector<8x32xf32>, vector<32x32xf32>, vector<8x32xf32> -> vector<8x32xf32>
    %27 = arith.addf %26, %20 : vector<8x32xf32>
    %cst_20 = arith.constant 0.000000e+00 : f32
    %28 = vector.broadcast %cst_20 : f32 to vector<8x32xf32>
    %29 = arith.maximumf %27, %28 : vector<8x32xf32>
    %cst_21 = arith.constant dense<0.000000e+00> : vector<8x32xf32>
    %30 = tpu.matmul %29, %8, %cst_21 {dimension_numbers = #tpu.dot_dimension_numbers<[1], [0], [0], [1], [0, 0, 1, 1], [], []>} : vector<8x32xf32>, vector<32x32xf32>, vector<8x32xf32> -> vector<8x32xf32>
    %31 = arith.addf %30, %11 : vector<8x32xf32>
    %32 = vector.extract_strided_slice %5 {offsets = [16, 0], sizes = [8, 32], strides = [1, 1]} : vector<64x32xf32> to vector<8x32xf32>
    %cst_22 = arith.constant dense<0.000000e+00> : vector<8x32xf32>
    %33 = tpu.matmul %25, %6, %cst_22 {dimension_numbers = #tpu.dot_dimension_numbers<[1], [0], [0], [1], [0, 0, 1, 1], [], []>} : vector<8x32xf32>, vector<32x32xf32>, vector<8x32xf32> -> vector<8x32xf32>
    %34 = arith.addf %32, %33 : vector<8x32xf32>
    %cst_23 = arith.constant 0.000000e+00 : f32
    %35 = vector.broadcast %cst_23 : f32 to vector<8x32xf32>
    %36 = arith.maximumf %34, %35 : vector<8x32xf32>
    %cst_24 = arith.constant dense<0.000000e+00> : vector<8x32xf32>
    %37 = tpu.matmul %36, %7, %cst_24 {dimension_numbers = #tpu.dot_dimension_numbers<[1], [0], [0], [1], [0, 0, 1, 1], [], []>} : vector<8x32xf32>, vector<32x32xf32>, vector<8x32xf32> -> vector<8x32xf32>
    %38 = arith.addf %37, %31 : vector<8x32xf32>
    %cst_25 = arith.constant 0.000000e+00 : f32
    %39 = vector.broadcast %cst_25 : f32 to vector<8x32xf32>
    %40 = arith.maximumf %38, %39 : vector<8x32xf32>
    %cst_26 = arith.constant dense<0.000000e+00> : vector<8x32xf32>
    %41 = tpu.matmul %40, %8, %cst_26 {dimension_numbers = #tpu.dot_dimension_numbers<[1], [0], [0], [1], [0, 0, 1, 1], [], []>} : vector<8x32xf32>, vector<32x32xf32>, vector<8x32xf32> -> vector<8x32xf32>
    %42 = arith.addf %41, %11 : vector<8x32xf32>
    %43 = vector.extract_strided_slice %5 {offsets = [24, 0], sizes = [8, 32], strides = [1, 1]} : vector<64x32xf32> to vector<8x32xf32>
    %cst_27 = arith.constant dense<0.000000e+00> : vector<8x32xf32>
    %44 = tpu.matmul %36, %6, %cst_27 {dimension_numbers = #tpu.dot_dimension_numbers<[1], [0], [0], [1], [0, 0, 1, 1], [], []>} : vector<8x32xf32>, vector<32x32xf32>, vector<8x32xf32> -> vector<8x32xf32>
    %45 = arith.addf %43, %44 : vector<8x32xf32>
    %cst_28 = arith.constant 0.000000e+00 : f32
    %46 = vector.broadcast %cst_28 : f32 to vector<8x32xf32>
    %47 = arith.maximumf %45, %46 : vector<8x32xf32>
    %cst_29 = arith.constant dense<0.000000e+00> : vector<8x32xf32>
    %48 = tpu.matmul %47, %7, %cst_29 {dimension_numbers = #tpu.dot_dimension_numbers<[1], [0], [0], [1], [0, 0, 1, 1], [], []>} : vector<8x32xf32>, vector<32x32xf32>, vector<8x32xf32> -> vector<8x32xf32>
    %49 = arith.addf %48, %42 : vector<8x32xf32>
    %cst_30 = arith.constant 0.000000e+00 : f32
    %50 = vector.broadcast %cst_30 : f32 to vector<8x32xf32>
    %51 = arith.maximumf %49, %50 : vector<8x32xf32>
    %cst_31 = arith.constant dense<0.000000e+00> : vector<8x32xf32>
    %52 = tpu.matmul %51, %8, %cst_31 {dimension_numbers = #tpu.dot_dimension_numbers<[1], [0], [0], [1], [0, 0, 1, 1], [], []>} : vector<8x32xf32>, vector<32x32xf32>, vector<8x32xf32> -> vector<8x32xf32>
    %53 = arith.addf %52, %11 : vector<8x32xf32>
    %54 = vector.extract_strided_slice %5 {offsets = [32, 0], sizes = [8, 32], strides = [1, 1]} : vector<64x32xf32> to vector<8x32xf32>
    %cst_32 = arith.constant dense<0.000000e+00> : vector<8x32xf32>
    %55 = tpu.matmul %47, %6, %cst_32 {dimension_numbers = #tpu.dot_dimension_numbers<[1], [0], [0], [1], [0, 0, 1, 1], [], []>} : vector<8x32xf32>, vector<32x32xf32>, vector<8x32xf32> -> vector<8x32xf32>
    %56 = arith.addf %54, %55 : vector<8x32xf32>
    %cst_33 = arith.constant 0.000000e+00 : f32
    %57 = vector.broadcast %cst_33 : f32 to vector<8x32xf32>
    %58 = arith.maximumf %56, %57 : vector<8x32xf32>
    %cst_34 = arith.constant dense<0.000000e+00> : vector<8x32xf32>
    %59 = tpu.matmul %58, %7, %cst_34 {dimension_numbers = #tpu.dot_dimension_numbers<[1], [0], [0], [1], [0, 0, 1, 1], [], []>} : vector<8x32xf32>, vector<32x32xf32>, vector<8x32xf32> -> vector<8x32xf32>
    %60 = arith.addf %59, %53 : vector<8x32xf32>
    %cst_35 = arith.constant 0.000000e+00 : f32
    %61 = vector.broadcast %cst_35 : f32 to vector<8x32xf32>
    %62 = arith.maximumf %60, %61 : vector<8x32xf32>
    %cst_36 = arith.constant dense<0.000000e+00> : vector<8x32xf32>
    %63 = tpu.matmul %62, %8, %cst_36 {dimension_numbers = #tpu.dot_dimension_numbers<[1], [0], [0], [1], [0, 0, 1, 1], [], []>} : vector<8x32xf32>, vector<32x32xf32>, vector<8x32xf32> -> vector<8x32xf32>
    %64 = arith.addf %63, %11 : vector<8x32xf32>
    %65 = vector.extract_strided_slice %5 {offsets = [40, 0], sizes = [8, 32], strides = [1, 1]} : vector<64x32xf32> to vector<8x32xf32>
    %cst_37 = arith.constant dense<0.000000e+00> : vector<8x32xf32>
    %66 = tpu.matmul %58, %6, %cst_37 {dimension_numbers = #tpu.dot_dimension_numbers<[1], [0], [0], [1], [0, 0, 1, 1], [], []>} : vector<8x32xf32>, vector<32x32xf32>, vector<8x32xf32> -> vector<8x32xf32>
    %67 = arith.addf %65, %66 : vector<8x32xf32>
    %cst_38 = arith.constant 0.000000e+00 : f32
    %68 = vector.broadcast %cst_38 : f32 to vector<8x32xf32>
    %69 = arith.maximumf %67, %68 : vector<8x32xf32>
    %cst_39 = arith.constant dense<0.000000e+00> : vector<8x32xf32>
    %70 = tpu.matmul %69, %7, %cst_39 {dimension_numbers = #tpu.dot_dimension_numbers<[1], [0], [0], [1], [0, 0, 1, 1], [], []>} : vector<8x32xf32>, vector<32x32xf32>, vector<8x32xf32> -> vector<8x32xf32>
    %71 = arith.addf %70, %64 : vector<8x32xf32>
    %cst_40 = arith.constant 0.000000e+00 : f32
    %72 = vector.broadcast %cst_40 : f32 to vector<8x32xf32>
    %73 = arith.maximumf %71, %72 : vector<8x32xf32>
    %cst_41 = arith.constant dense<0.000000e+00> : vector<8x32xf32>
    %74 = tpu.matmul %73, %8, %cst_41 {dimension_numbers = #tpu.dot_dimension_numbers<[1], [0], [0], [1], [0, 0, 1, 1], [], []>} : vector<8x32xf32>, vector<32x32xf32>, vector<8x32xf32> -> vector<8x32xf32>
    %75 = arith.addf %74, %11 : vector<8x32xf32>
    %76 = vector.extract_strided_slice %5 {offsets = [48, 0], sizes = [8, 32], strides = [1, 1]} : vector<64x32xf32> to vector<8x32xf32>
    %cst_42 = arith.constant dense<0.000000e+00> : vector<8x32xf32>
    %77 = tpu.matmul %69, %6, %cst_42 {dimension_numbers = #tpu.dot_dimension_numbers<[1], [0], [0], [1], [0, 0, 1, 1], [], []>} : vector<8x32xf32>, vector<32x32xf32>, vector<8x32xf32> -> vector<8x32xf32>
    %78 = arith.addf %76, %77 : vector<8x32xf32>
    %cst_43 = arith.constant 0.000000e+00 : f32
    %79 = vector.broadcast %cst_43 : f32 to vector<8x32xf32>
    %80 = arith.maximumf %78, %79 : vector<8x32xf32>
    %cst_44 = arith.constant dense<0.000000e+00> : vector<8x32xf32>
    %81 = tpu.matmul %80, %7, %cst_44 {dimension_numbers = #tpu.dot_dimension_numbers<[1], [0], [0], [1], [0, 0, 1, 1], [], []>} : vector<8x32xf32>, vector<32x32xf32>, vector<8x32xf32> -> vector<8x32xf32>
    %82 = arith.addf %81, %75 : vector<8x32xf32>
    %cst_45 = arith.constant 0.000000e+00 : f32
    %83 = vector.broadcast %cst_45 : f32 to vector<8x32xf32>
    %84 = arith.maximumf %82, %83 : vector<8x32xf32>
    %cst_46 = arith.constant dense<0.000000e+00> : vector<8x32xf32>
    %85 = tpu.matmul %84, %8, %cst_46 {dimension_numbers = #tpu.dot_dimension_numbers<[1], [0], [0], [1], [0, 0, 1, 1], [], []>} : vector<8x32xf32>, vector<32x32xf32>, vector<8x32xf32> -> vector<8x32xf32>
    %86 = arith.addf %85, %11 : vector<8x32xf32>
    %87 = vector.extract_strided_slice %5 {offsets = [56, 0], sizes = [8, 32], strides = [1, 1]} : vector<64x32xf32> to vector<8x32xf32>
    %cst_47 = arith.constant dense<0.000000e+00> : vector<8x32xf32>
    %88 = tpu.matmul %80, %6, %cst_47 {dimension_numbers = #tpu.dot_dimension_numbers<[1], [0], [0], [1], [0, 0, 1, 1], [], []>} : vector<8x32xf32>, vector<32x32xf32>, vector<8x32xf32> -> vector<8x32xf32>
    %89 = arith.addf %87, %88 : vector<8x32xf32>
    %cst_48 = arith.constant 0.000000e+00 : f32
    %90 = vector.broadcast %cst_48 : f32 to vector<8x32xf32>
    %91 = arith.maximumf %89, %90 : vector<8x32xf32>
    %cst_49 = arith.constant dense<0.000000e+00> : vector<8x32xf32>
    %92 = tpu.matmul %91, %7, %cst_49 {dimension_numbers = #tpu.dot_dimension_numbers<[1], [0], [0], [1], [0, 0, 1, 1], [], []>} : vector<8x32xf32>, vector<32x32xf32>, vector<8x32xf32> -> vector<8x32xf32>
    %93 = arith.addf %92, %86 : vector<8x32xf32>
    %cst_50 = arith.constant 0.000000e+00 : f32
    %94 = vector.broadcast %cst_50 : f32 to vector<8x32xf32>
    %95 = arith.maximumf %93, %94 : vector<8x32xf32>
    %c0_51 = arith.constant 0 : index
    %c0_52 = arith.constant 0 : index
    %96 = vector.load %arg7[%c0_51, %c0_52] : memref<32x16xf32, #tpu.memory_space<vmem>>, vector<32x16xf32>
    %cst_53 = arith.constant dense<0.000000e+00> : vector<8x16xf32>
    %97 = tpu.matmul %95, %96, %cst_53 {dimension_numbers = #tpu.dot_dimension_numbers<[1], [0], [0], [1], [0, 0, 1, 1], [], []>} : vector<8x32xf32>, vector<32x16xf32>, vector<8x16xf32> -> vector<8x16xf32>
    %c0_54 = arith.constant 0 : index
    %c0_55 = arith.constant 0 : index
    %98 = vector.load %arg8[%c0_54, %c0_55] : memref<1x16xf32, #tpu.memory_space<vmem>>, vector<1x16xf32>
    %99 = vector.broadcast %98 : vector<1x16xf32> to vector<8x16xf32>
    %100 = arith.addf %97, %99 : vector<8x16xf32>
    %c0_56 = arith.constant 0 : index
    %c0_57 = arith.constant 0 : index
    %101 = vector.load %arg9[%c0_56, %c0_57] : memref<8x16xf32, #tpu.memory_space<vmem>>, vector<8x16xf32>
    tpu.vector_store %arg9[%c0_56, %c0_57], %100 {strides = array<i32>} : memref<8x16xf32, #tpu.memory_space<vmem>>, vector<8x16xf32>,
    return
  }
}

</mosaic_0001>

<bundles_post_ra>
// kernel: tpu_custom_call.1
= control target key start
LH: loop header
LB: loop body
LE: loop exit
PB: predicated region body
PF: predicated region fallthrough
CT: control target
= control target key end

     0   :  { %14 = vsyncpa [#allocation3], 0  ;;  %s2867_s0 = inlined_call_operand.vmem [shape: f32[64,32], index: 0, kind: input, shape index: {}]   ;;  %s2868_s1 = inlined_call_operand.vmem [shape: f32[32,32], index: 1, kind: input, shape index: {}]   ;;  %s2869_s2 = inlined_call_operand.vmem [shape: f32[32,32], index: 2, kind: input, shape index: {}]   ;;  %s2870_s3 = inlined_call_operand.vmem [shape: f32[32,32], index: 3, kind: input, shape index: {}]   ;;  %s2871_s4 = inlined_call_operand.hbm [shape: f32[32,32], index: 4, kind: input, shape index: {}]   ;;  %s2872_s5 = inlined_call_operand.vmem [shape: f32[1,32], index: 5, kind: input, shape index: {}]   ;;  %s2873_s6 = inlined_call_operand.vmem [shape: f32[1,32], index: 6, kind: input, shape index: {}]   ;;  %s2874_s7 = inlined_call_operand.vmem [shape: f32[32,16], index: 7, kind: input, shape index: {}]   ;;  %s2875_s8 = inlined_call_operand.vmem [shape: f32[1,16], index: 8, kind: input, shape index: {}]   ;;  %s2876_s9 = inlined_call_operand.hbm [shape: f32[8,16], index: 9, kind: output, shape index: {}]  }
   0x1   :  { %15 = vsyncpa [#allocation4], 0  ;;  %s2408_s30 = smov [#allocation2]  }
   0x2   :  { %s29_s10 = sshll.u32 %s2408_s30, 4  ;;  %s30_s10 = int_to_ptr.vmem [resolvable:$true] %s29_s10 }
   0x3   :  { %s2372_s11 = scalar_lea.vmem %s30_s10, 512  ;;  %p2377_p1 = scmp.lt.s32.totalorder %s30_s10, %s30_s10 }
   0x4   :  { %p2373_p0 = scmp.ne.s32.totalorder %s30_s10, %s2372_s11  ;;  %p2378_p2 = scmp.lt.s32.totalorder %s2372_s11, %s2372_s11 }
   0x6   :  { %p2379_p3 = por %p2378_p2, %p2377_p1 }
   0x8   :  { %p2380_p4 = pnand %p2379_p3, %p2373_p0 }
   0xa   :  { %2383 = shalt.err (!%p2380_p4)
}
   0xb   :  { %s2409_s12 = smov 128   ;;  %s2410_s13 = smov 8  }
   0xc   :  { %35 = dma.hbm_to_vmem [thread:$0]  %s2871_s4, 512, %s30_s10, [#allocation3], %s2409_s12, %s2409_s12, %s2410_s13  }
   0xd   :  { %2404 = dma.done.wait [#allocation3], 512  }
   0xe   :  { %2405 = vsyncadd [#allocation3], 4294966784  ;;  %v2411_v0 = vmov 0.0   ;;  %vm66_vm0 = vcmask 261120   ;;  %v58_v1 = vld [vmem:[%s2868_s1 + $0x18] sm:$0xff]  ;;  %v57_v2 = vld [vmem:[%s2868_s1 + $0x10] sm:$0xff] }
   0xf   :  { %2105 = vmatprep.subr.mxu1 %v2411_v0  ;;  %2085 = vmatprep.subr.mxu0 %v58_v1  ;;  %v47_v3 = vld [vmem:[%s2867_s0] sm:$0xff]  ;;  %v56_v4 = vld [vmem:[%s2868_s1 + $0x8] sm:$0xff]  ;;  %v49_v7 = vld [vmem:[%s2867_s0 + $0x10] sm:$0xff]  ;;  %vm2412_vm1 = vmmov 0   ;;  %s2413_s19 = smov [#allocation5]   ;;  %vm1907_vm2 = vcmask 130048  }
  0x10   :  { %2086 = vmatpush3.msra.mxu0 %v58_v1  ;;  %2093 = vmatprep.mubr.msk.f32.mxu0 %vm66_vm0, %v47_v3  ;;  %v55_v5 = vld [vmem:[%s2868_s1] sm:$0xff]  ;;  %v48_v6 = vld [vmem:[%s2867_s0 + $0x8] sm:$0xff]  ;;  %v2493_v8 = vld [vmem:[%s2869_s2 + $0x18] sm:$0xff]  ;;  %s1915_s20 = sshll.u32 %s2413_s19, 4  ;;  %s1916_s20 = int_to_ptr.vmem [resolvable:$true] %s1915_s20 }
  0x11   :  { %2087 = vmatprep.subr.mxu0 %v57_v2  ;;  %v50_v9 = vld [vmem:[%s2867_s0 + $0x18] sm:$0xff]  ;;  %v51_v10 = vld [vmem:[%s2867_s0 + $0x20] sm:$0xff]  ;;  %v52_v11 = vld [vmem:[%s2867_s0 + $0x28] sm:$0xff]  ;;  %2113 = vmatprep.mubr.msk.f32.mxu1 %vm2412_vm1, %v2411_v0  ;;  %p2389_p6 = scmp.lt.s32.totalorder %s1916_s20, %s1916_s20 }
  0x12   :  { %2088 = vmatpush3.msra.mxu0 %v57_v2  ;;  %v2515_v12 = vld [vmem:[%s2870_s3 + $0x18] sm:$0xff]  ;;  %v53_v13 = vld [vmem:[%s2867_s0 + $0x30] sm:$0xff]  ;;  %v2542_v17 = vld [vmem:[%s2870_s3 + $0x8] sm:$0xff] }
  0x13   :  { %2089 = vmatprep.subr.mxu0 %v56_v4  ;;  %2106 = vmatpush3.msra.mxu1 %v2515_v12  ;;  %v2525_v14 = vld [vmem:[%s2870_s3 + $0x10] sm:$0xff]  ;;  %v54_v16 = vld [vmem:[%s2867_s0 + $0x38] sm:$0xff]  ;;  %v2547_v18 = vld [vmem:[%s2869_s2 + $0x8] sm:$0xff] }
  0x14   :  { %2090 = vmatpush3.msra.mxu0 %v56_v4  ;;  %2107 = vmatprep.subr.mxu1 %v2411_v0  ;;  %v2530_v15 = vld [vmem:[%s2869_s2 + $0x10] sm:$0xff]  ;;  %v2556_v19 = vld [vmem:[%s2870_s3] sm:$0xff]  ;;  %v2579_v26 = vld [vmem:[#allocation2 + $0x18] sm:$0xff] }
  0x15   :  { %2091 = vmatprep.subr.mxu0 %v55_v5  ;;  %2108 = vmatpush3.msra.mxu1 %v2525_v14  ;;  %v2561_v20 = vld [vmem:[%s2869_s2] sm:$0xff]  ;;  %v2583_v27 = vld [vmem:[#allocation2 + $0x10] sm:$0xff]  ;;  %v2597_v28 = vld [vmem:[#allocation2 + $0x8] sm:$0xff] }
  0x16   :  { %2092 = vmatpush3.msra.mxu0 %v55_v5  ;;  %2109 = vmatprep.subr.mxu1 %v2411_v0  ;;  %v2576_v22 = vld [vmem:[%s2872_s5] ss:$0 sm:$0xff] }
  0x17   :  { %2094 = vmatmul.mubr.msk.f32.vlgmr.msra.gmra.mxu0 %vm66_vm0, %v48_v6  ;;  %2127 = vmatprep.subr.mxu0 %v2411_v0  ;;  %v2602_v29 = vld [vmem:[#allocation2] sm:$0xff] }
  0x18   :  { %2096 = vmatprep.mubr.msk.f32.mxu0 %vm66_vm0, %v49_v7  ;;  %2128 = vmatpush3.msra.mxu0 %v2493_v8  ;;  %v2622_v36 = vld [vmem:[%s2873_s6] ss:$0 sm:$0xff] }
  0x19   :  { %2129 = vmatprep.subr.mxu0 %v2411_v0  ;;  %2110 = vmatpush3.msra.mxu1 %v2542_v17 }
  0x1a   :  { %2130 = vmatpush3.msra.mxu0 %v2530_v15  ;;  %2111 = vmatprep.subr.mxu1 %v2411_v0 }
  0x1b   :  { %2097 = vmatmul.mubr.msk.f32.gmra.mxu0 %vm66_vm0, %v50_v9  ;;  %2131 = vmatprep.subr.mxu0 %v2411_v0 }
  0x1c   :  { %2099 = vmatprep.mubr.msk.f32.mxu0 %vm66_vm0, %v51_v10  ;;  %2132 = vmatpush3.msra.mxu0 %v2547_v18 }
  0x1d   :  { %2133 = vmatprep.subr.mxu0 %v2411_v0  ;;  %2112 = vmatpush3.msra.mxu1 %v2556_v19 }
  0x1e   :  { %2134 = vmatpush3.msra.mxu0 %v2561_v20  ;;  %2116 = vmatprep.subr.mxu1 %v2411_v0 }
  0x1f   :  { %2100 = vmatmul.mubr.msk.f32.gmra.mxu0 %vm66_vm0, %v52_v11  ;;  %2149 = vmatprep.subr.mxu0 %v2411_v0 }
  0x20   :  { %2102 = vmatprep.mubr.msk.f32.mxu0 %vm66_vm0, %v53_v13 }
  0x23   :  { %2103 = vmatmul.mubr.msk.f32.gmra.mxu0 %vm66_vm0, %v54_v16 }
  0x24   :  { %2135 = vmatprep.mubr.msk.f32.mxu0 %vm2412_vm1, %v2411_v0 }
  0xd7   :  { %v2095_v21 = vpop.f32.mrf.mxu0 }
  0xd8   :  { %v163_v43 = vadd.f32 %v2095_v21, %v2576_v22 }
  0xd9   :  { %v157_v23 = vpop.f32.mrf.mxu0 }
  0xda   :  { %v158_v24 = vadd.f32 %v2576_v22, %v157_v23 }
  0xdb   :  { %v2609_v30 = vpop.f32.mrf.mxu0 }
  0xdc   :  { %v215_v25 = vmax.f32 %v158_v24, 0.0  ;;  %v173_v2 = vadd.f32 %v2609_v30, %v2576_v22 }
  0xdd   :  { %v167_v31 = vpop.f32.mrf.mxu0 }
  0xde   :  { %2114 = vmatmul.mubr.msk.f32.vlgmr.msra.gmra.mxu1 %vm66_vm0, %v215_v25  ;;  %2136 = vmatmul.mubr.msk.f32.vlgmr.msra.gmra.mxu0 %vm66_vm0, %v215_v25  ;;  %v168_v53 = vadd.f32 %v2576_v22, %v167_v31 }
  0xdf   :  { %2117 = vmatpush3.msra.mxu1 %v2579_v26  ;;  %2124 = vmatprep.mubr.msk.f32.mxu1 %vm2412_vm1, %v2411_v0  ;;  %v2611_v32 = vpop.f32.mrf.mxu0 }
  0xe0   :  { %2118 = vmatprep.subr.mxu1 %v2411_v0  ;;  %2150 = vmatpush3.msra.mxu0 %v2579_v26 }
  0xe1   :  { %2119 = vmatpush3.msra.mxu1 %v2583_v27  ;;  %2151 = vmatprep.subr.mxu0 %v2411_v0  ;;  %v2613_v33 = vpop.f32.mrf.mxu0 }
  0xe2   :  { %2120 = vmatprep.subr.mxu1 %v2411_v0  ;;  %2152 = vmatpush3.msra.mxu0 %v2583_v27  ;;  %v178_v23 = vadd.f32 %v2576_v22, %v2613_v33 }
  0xe3   :  { %2153 = vmatprep.subr.mxu0 %v2411_v0  ;;  %2157 = vmatprep.mubr.msk.f32.mxu0 %vm2412_vm1, %v2411_v0  ;;  %v2615_v34 = vpop.f32.mrf.mxu0 }
  0xe4   :  { %2121 = vmatpush3.msra.mxu1 %v2597_v28  ;;  %2154 = vmatpush3.msra.mxu0 %v2597_v28 }
  0xe5   :  { %2122 = vmatprep.subr.mxu1 %v2411_v0  ;;  %2155 = vmatprep.subr.mxu0 %v2411_v0  ;;  %v2617_v35 = vpop.f32.mrf.mxu0 }
  0xe6   :  { %2123 = vmatpush3.msra.mxu1 %v2602_v29  ;;  %2156 = vmatpush3.msra.mxu0 %v2602_v29 }
  0xe7   :  { %2138 = vmatprep.subr.mxu1 %v2411_v0  ;;  %2171 = vmatprep.subr.mxu0 %v2411_v0 }
 0x19e   :  { %v285_v37 = vpop.f32.mrf.mxu1  ;;  %v429_v38 = vpop.f32.mrf.mxu0 }
 0x19f   :  { %v286_v39 = vadd.f32 %v2622_v36, %v285_v37  ;;  %v433_v44 = vadd.f32 %v429_v38, %v163_v43  ;;  %v183_v43 = vadd.f32 %v2611_v32, %v2576_v22 }
 0x1a0   :  { %v2115_v40 = vpop.f32.mrf.mxu1  ;;  %v2137_v41 = vpop.f32.mrf.mxu0 }
 0x1a1   :  { %v289_v42 = vmax.f32 %v286_v39, 0.0  ;;  %v434_v45 = vmax.f32 %v433_v44, 0.0 }
 0x1a3   :  { %2125 = vmatmul.mubr.msk.f32.vlgmr.msra.gmra.mxu1 %vm66_vm0, %v289_v42 }
 0x1a4   :  { %2139 = vmatpush3.msra.mxu1 %v2515_v12  ;;  %2146 = vmatprep.mubr.msk.f32.mxu1 %vm2412_vm1, %v2411_v0 }
 0x1a5   :  { %2140 = vmatprep.subr.mxu1 %v2411_v0 }
 0x1a6   :  { %2141 = vmatpush3.msra.mxu1 %v2525_v14 }
 0x1a7   :  { %2142 = vmatprep.subr.mxu1 %v2411_v0 }
 0x1a8   :  { %2143 = vmatpush3.msra.mxu1 %v2542_v17 }
 0x1a9   :  { %2144 = vmatprep.subr.mxu1 %v2411_v0 }
 0x1aa   :  { %2145 = vmatpush3.msra.mxu1 %v2556_v19 }
 0x1ab   :  { %2147 = vmatmul.mubr.msk.f32.vlgmr.msra.gmra.mxu1 %vm66_vm0, %v434_v45  ;;  %2160 = vmatprep.subr.mxu1 %v2411_v0 }
 0x1ac   :  { %2161 = vmatpush3.msra.mxu1 %v2493_v8  ;;  %2168 = vmatprep.mubr.msk.f32.mxu1 %vm2412_vm1, %v2411_v0 }
 0x1ad   :  { %2162 = vmatprep.subr.mxu1 %v2411_v0 }
 0x1ae   :  { %2163 = vmatpush3.msra.mxu1 %v2530_v15 }
 0x1af   :  { %2164 = vmatprep.subr.mxu1 %v2411_v0 }
 0x1b0   :  { %2165 = vmatpush3.msra.mxu1 %v2547_v18 }
 0x1b1   :  { %2166 = vmatprep.subr.mxu1 %v2411_v0 }
 0x1b2   :  { %2167 = vmatpush3.msra.mxu1 %v2561_v20 }
 0x1b3   :  { %2169 = vmatmul.mubr.msk.f32.vlgmr.msra.gmra.mxu1 %vm66_vm0, %v434_v45  ;;  %2182 = vmatprep.subr.mxu1 %v2411_v0 }
 0x1b4   :  { %2183 = vmatpush3.msra.mxu1 %v2579_v26  ;;  %2190 = vmatprep.mubr.msk.f32.mxu1 %vm2412_vm1, %v2411_v0 }
 0x1b5   :  { %2184 = vmatprep.subr.mxu1 %v2411_v0 }
 0x1b6   :  { %2185 = vmatpush3.msra.mxu1 %v2583_v27 }
 0x1b7   :  { %2186 = vmatprep.subr.mxu1 %v2411_v0 }
 0x1b8   :  { %2187 = vmatpush3.msra.mxu1 %v2597_v28 }
 0x1b9   :  { %2188 = vmatprep.subr.mxu1 %v2411_v0 }
 0x1ba   :  { %2189 = vmatpush3.msra.mxu1 %v2602_v29 }
 0x1bb   :  { %2204 = vmatprep.subr.mxu1 %v2411_v0 }
 0x263   :  { %v359_v46 = vpop.f32.mrf.mxu1 }
 0x264   :  { %v360_v48 = vadd.f32 %v2622_v36, %v359_v46 }
 0x265   :  { %v2126_v47 = vpop.f32.mrf.mxu1 }
 0x26b   :  { %v504_v49 = vpop.f32.mrf.mxu1 }
 0x26c   :  { %v505_v50 = vadd.f32 %v504_v49, %v360_v48 }
 0x26d   :  { %v2148_v51 = vpop.f32.mrf.mxu1 }
 0x26e   :  { %v508_v52 = vmax.f32 %v505_v50, 0.0 }
 0x270   :  { %2158 = vmatmul.mubr.msk.f32.vlgmr.msra.gmra.mxu0 %vm66_vm0, %v508_v52 }
 0x271   :  { %2172 = vmatpush3.msra.mxu0 %v2515_v12  ;;  %2179 = vmatprep.mubr.msk.f32.mxu0 %vm2412_vm1, %v2411_v0 }
 0x272   :  { %2173 = vmatprep.subr.mxu0 %v2411_v0 }
 0x273   :  { %2174 = vmatpush3.msra.mxu0 %v2525_v14  ;;  %v648_v54 = vpop.f32.mrf.mxu1 }
 0x274   :  { %v652_v55 = vadd.f32 %v648_v54, %v168_v53  ;;  %2175 = vmatprep.subr.mxu0 %v2411_v0 }
 0x275   :  { %2176 = vmatpush3.msra.mxu0 %v2542_v17  ;;  %v2170_v56 = vpop.f32.mrf.mxu1 }
 0x276   :  { %v653_v57 = vmax.f32 %v652_v55, 0.0  ;;  %2177 = vmatprep.subr.mxu0 %v2411_v0 }
 0x277   :  { %2178 = vmatpush3.msra.mxu0 %v2556_v19 }
 0x278   :  { %2193 = vmatprep.subr.mxu0 %v2411_v0  ;;  %2180 = vmatmul.mubr.msk.f32.vlgmr.msra.gmra.mxu0 %vm66_vm0, %v653_v57 }
 0x279   :  { %2194 = vmatpush3.msra.mxu0 %v2493_v8  ;;  %2201 = vmatprep.mubr.msk.f32.mxu0 %vm2412_vm1, %v2411_v0 }
 0x27a   :  { %2195 = vmatprep.subr.mxu0 %v2411_v0 }
 0x27b   :  { %2196 = vmatpush3.msra.mxu0 %v2530_v15 }
 0x27c   :  { %2197 = vmatprep.subr.mxu0 %v2411_v0 }
 0x27d   :  { %2198 = vmatpush3.msra.mxu0 %v2547_v18 }
 0x27e   :  { %2199 = vmatprep.subr.mxu0 %v2411_v0 }
 0x27f   :  { %2200 = vmatpush3.msra.mxu0 %v2561_v20 }
 0x280   :  { %2202 = vmatmul.mubr.msk.f32.vlgmr.msra.gmra.mxu0 %vm66_vm0, %v653_v57  ;;  %2215 = vmatprep.subr.mxu0 %v2411_v0 }
 0x281   :  { %2216 = vmatpush3.msra.mxu0 %v2579_v26  ;;  %2223 = vmatprep.mubr.msk.f32.mxu0 %vm2412_vm1, %v2411_v0 }
 0x282   :  { %2217 = vmatprep.subr.mxu0 %v2411_v0 }
 0x283   :  { %2218 = vmatpush3.msra.mxu0 %v2583_v27 }
 0x284   :  { %2219 = vmatprep.subr.mxu0 %v2411_v0 }
 0x285   :  { %2220 = vmatpush3.msra.mxu0 %v2597_v28 }
 0x286   :  { %2221 = vmatprep.subr.mxu0 %v2411_v0 }
 0x287   :  { %2222 = vmatpush3.msra.mxu0 %v2602_v29 }
 0x288   :  { %2237 = vmatprep.subr.mxu0 %v2411_v0 }
 0x330   :  { %v578_v58 = vpop.f32.mrf.mxu0 }
 0x331   :  { %v579_v60 = vadd.f32 %v2622_v36, %v578_v58 }
 0x332   :  { %v2159_v59 = vpop.f32.mrf.mxu0 }
 0x338   :  { %v723_v61 = vpop.f32.mrf.mxu0 }
 0x339   :  { %v724_v62 = vadd.f32 %v723_v61, %v579_v60 }
 0x33a   :  { %v2181_v63 = vpop.f32.mrf.mxu0 }
 0x33b   :  { %v727_v1 = vmax.f32 %v724_v62, 0.0 }
 0x33d   :  { %2191 = vmatmul.mubr.msk.f32.vlgmr.msra.gmra.mxu1 %vm66_vm0, %v727_v1 }
 0x33e   :  { %2205 = vmatpush3.msra.mxu1 %v2515_v12  ;;  %2212 = vmatprep.mubr.msk.f32.mxu1 %vm2412_vm1, %v2411_v0 }
 0x33f   :  { %2206 = vmatprep.subr.mxu1 %v2411_v0 }
 0x340   :  { %v867_v3 = vpop.f32.mrf.mxu0  ;;  %2207 = vmatpush3.msra.mxu1 %v2525_v14 }
 0x341   :  { %v871_v4 = vadd.f32 %v867_v3, %v173_v2  ;;  %2208 = vmatprep.subr.mxu1 %v2411_v0 }
 0x342   :  { %v2203_v5 = vpop.f32.mrf.mxu0  ;;  %2209 = vmatpush3.msra.mxu1 %v2542_v17 }
 0x343   :  { %v872_v6 = vmax.f32 %v871_v4, 0.0  ;;  %2210 = vmatprep.subr.mxu1 %v2411_v0  ;;  %v1956_v4 = vld [vmem:[%s2875_s8] ss:$0 sm:$0xff] }
 0x344   :  { %2211 = vmatpush3.msra.mxu1 %v2556_v19 }
 0x345   :  { %2213 = vmatmul.mubr.msk.f32.vlgmr.msra.gmra.mxu1 %vm66_vm0, %v872_v6  ;;  %2226 = vmatprep.subr.mxu1 %v2411_v0 }
 0x346   :  { %2227 = vmatpush3.msra.mxu1 %v2493_v8  ;;  %2234 = vmatprep.mubr.msk.f32.mxu1 %vm2412_vm1, %v2411_v0 }
 0x347   :  { %2228 = vmatprep.subr.mxu1 %v2411_v0 }
 0x348   :  { %2229 = vmatpush3.msra.mxu1 %v2530_v15 }
 0x349   :  { %2230 = vmatprep.subr.mxu1 %v2411_v0 }
 0x34a   :  { %2231 = vmatpush3.msra.mxu1 %v2547_v18 }
 0x34b   :  { %2232 = vmatprep.subr.mxu1 %v2411_v0 }
 0x34c   :  { %2233 = vmatpush3.msra.mxu1 %v2561_v20 }
 0x34d   :  { %2235 = vmatmul.mubr.msk.f32.vlgmr.msra.gmra.mxu1 %vm66_vm0, %v872_v6  ;;  %2248 = vmatprep.subr.mxu1 %v2411_v0 }
 0x34e   :  { %2249 = vmatpush3.msra.mxu1 %v2579_v26  ;;  %2256 = vmatprep.mubr.msk.f32.mxu1 %vm2412_vm1, %v2411_v0 }
 0x34f   :  { %2250 = vmatprep.subr.mxu1 %v2411_v0 }
 0x350   :  { %2251 = vmatpush3.msra.mxu1 %v2583_v27 }
 0x351   :  { %2252 = vmatprep.subr.mxu1 %v2411_v0 }
 0x352   :  { %2253 = vmatpush3.msra.mxu1 %v2597_v28 }
 0x353   :  { %2254 = vmatprep.subr.mxu1 %v2411_v0 }
 0x354   :  { %2255 = vmatpush3.msra.mxu1 %v2602_v29 }
 0x355   :  { %2270 = vmatprep.subr.mxu1 %v2411_v0 }
 0x3fd   :  { %v797_v7 = vpop.f32.mrf.mxu1 }
 0x3fe   :  { %v798_v10 = vadd.f32 %v2622_v36, %v797_v7 }
 0x3ff   :  { %v2192_v9 = vpop.f32.mrf.mxu1 }
 0x405   :  { %v942_v11 = vpop.f32.mrf.mxu1 }
 0x406   :  { %v943_v13 = vadd.f32 %v942_v11, %v798_v10 }
 0x407   :  { %v2214_v16 = vpop.f32.mrf.mxu1 }
 0x408   :  { %v946_v21 = vmax.f32 %v943_v13, 0.0 }
 0x40a   :  { %2224 = vmatmul.mubr.msk.f32.vlgmr.msra.gmra.mxu0 %vm66_vm0, %v946_v21 }
 0x40b   :  { %2238 = vmatpush3.msra.mxu0 %v2515_v12  ;;  %2245 = vmatprep.mubr.msk.f32.mxu0 %vm2412_vm1, %v2411_v0 }
 0x40c   :  { %2239 = vmatprep.subr.mxu0 %v2411_v0 }
 0x40d   :  { %2240 = vmatpush3.msra.mxu0 %v2525_v14  ;;  %v1086_v24 = vpop.f32.mrf.mxu1 }
 0x40e   :  { %v1090_v25 = vadd.f32 %v1086_v24, %v178_v23  ;;  %2241 = vmatprep.subr.mxu0 %v2411_v0 }
 0x40f   :  { %2242 = vmatpush3.msra.mxu0 %v2542_v17  ;;  %v2236_v30 = vpop.f32.mrf.mxu1 }
 0x410   :  { %v1091_v31 = vmax.f32 %v1090_v25, 0.0  ;;  %2243 = vmatprep.subr.mxu0 %v2411_v0 }
 0x411   :  { %2244 = vmatpush3.msra.mxu0 %v2556_v19 }
 0x412   :  { %2259 = vmatprep.subr.mxu0 %v2411_v0  ;;  %2246 = vmatmul.mubr.msk.f32.vlgmr.msra.gmra.mxu0 %vm66_vm0, %v1091_v31 }
 0x413   :  { %2260 = vmatpush3.msra.mxu0 %v2493_v8  ;;  %2267 = vmatprep.mubr.msk.f32.mxu0 %vm2412_vm1, %v2411_v0 }
 0x414   :  { %2261 = vmatprep.subr.mxu0 %v2411_v0 }
 0x415   :  { %2262 = vmatpush3.msra.mxu0 %v2530_v15 }
 0x416   :  { %2263 = vmatprep.subr.mxu0 %v2411_v0 }
 0x417   :  { %2264 = vmatpush3.msra.mxu0 %v2547_v18 }
 0x418   :  { %2265 = vmatprep.subr.mxu0 %v2411_v0 }
 0x419   :  { %2266 = vmatpush3.msra.mxu0 %v2561_v20 }
 0x41a   :  { %2268 = vmatmul.mubr.msk.f32.vlgmr.msra.gmra.mxu0 %vm66_vm0, %v1091_v31  ;;  %2281 = vmatprep.subr.mxu0 %v2411_v0 }
 0x41b   :  { %2282 = vmatpush3.msra.mxu0 %v2579_v26  ;;  %2289 = vmatprep.mubr.msk.f32.mxu0 %vm2412_vm1, %v2411_v0 }
 0x41c   :  { %2283 = vmatprep.subr.mxu0 %v2411_v0 }
 0x41d   :  { %2284 = vmatpush3.msra.mxu0 %v2583_v27 }
 0x41e   :  { %2285 = vmatprep.subr.mxu0 %v2411_v0 }
 0x41f   :  { %2286 = vmatpush3.msra.mxu0 %v2597_v28 }
 0x420   :  { %2287 = vmatprep.subr.mxu0 %v2411_v0 }
 0x421   :  { %2288 = vmatpush3.msra.mxu0 %v2602_v29 }
 0x422   :  { %2303 = vmatprep.subr.mxu0 %v2411_v0 }
 0x4ca   :  { %v1016_v33 = vpop.f32.mrf.mxu0 }
 0x4cb   :  { %v1017_v38 = vadd.f32 %v2622_v36, %v1016_v33 }
 0x4cc   :  { %v2225_v37 = vpop.f32.mrf.mxu0 }
 0x4d2   :  { %v1161_v39 = vpop.f32.mrf.mxu0 }
 0x4d3   :  { %v1162_v40 = vadd.f32 %v1161_v39, %v1017_v38 }
 0x4d4   :  { %v2247_v41 = vpop.f32.mrf.mxu0 }
 0x4d5   :  { %v1165_v42 = vmax.f32 %v1162_v40, 0.0 }
 0x4d7   :  { %2257 = vmatmul.mubr.msk.f32.vlgmr.msra.gmra.mxu1 %vm66_vm0, %v1165_v42 }
 0x4d8   :  { %2271 = vmatpush3.msra.mxu1 %v2515_v12  ;;  %2278 = vmatprep.mubr.msk.f32.mxu1 %vm2412_vm1, %v2411_v0 }
 0x4d9   :  { %2272 = vmatprep.subr.mxu1 %v2411_v0 }
 0x4da   :  { %v1305_v44 = vpop.f32.mrf.mxu0  ;;  %2273 = vmatpush3.msra.mxu1 %v2525_v14 }
 0x4db   :  { %v1309_v45 = vadd.f32 %v1305_v44, %v183_v43  ;;  %2274 = vmatprep.subr.mxu1 %v2411_v0 }
 0x4dc   :  { %v2269_v46 = vpop.f32.mrf.mxu0  ;;  %2275 = vmatpush3.msra.mxu1 %v2542_v17 }
 0x4dd   :  { %v1310_v47 = vmax.f32 %v1309_v45, 0.0  ;;  %2276 = vmatprep.subr.mxu1 %v2411_v0 }
 0x4de   :  { %2277 = vmatpush3.msra.mxu1 %v2556_v19 }
 0x4df   :  { %2279 = vmatmul.mubr.msk.f32.vlgmr.msra.gmra.mxu1 %vm66_vm0, %v1310_v47  ;;  %2292 = vmatprep.subr.mxu1 %v2411_v0 }
 0x4e0   :  { %2293 = vmatpush3.msra.mxu1 %v2493_v8  ;;  %2300 = vmatprep.mubr.msk.f32.mxu1 %vm2412_vm1, %v2411_v0 }
 0x4e1   :  { %2294 = vmatprep.subr.mxu1 %v2411_v0 }
 0x4e2   :  { %2295 = vmatpush3.msra.mxu1 %v2530_v15 }
 0x4e3   :  { %2296 = vmatprep.subr.mxu1 %v2411_v0 }
 0x4e4   :  { %2297 = vmatpush3.msra.mxu1 %v2547_v18 }
 0x4e5   :  { %2298 = vmatprep.subr.mxu1 %v2411_v0 }
 0x4e6   :  { %2299 = vmatpush3.msra.mxu1 %v2561_v20 }
 0x4e7   :  { %2301 = vmatmul.mubr.msk.f32.vlgmr.msra.gmra.mxu1 %vm66_vm0, %v1310_v47  ;;  %2314 = vmatprep.subr.mxu1 %v2411_v0 }
 0x4e8   :  { %2315 = vmatpush3.msra.mxu1 %v2579_v26  ;;  %2322 = vmatprep.mubr.msk.f32.mxu1 %vm2412_vm1, %v2411_v0 }
 0x4e9   :  { %2316 = vmatprep.subr.mxu1 %v2411_v0 }
 0x4ea   :  { %2317 = vmatpush3.msra.mxu1 %v2583_v27  ;;  %v188_v27 = vadd.f32 %v2576_v22, %v2617_v35 }
 0x4eb   :  { %2318 = vmatprep.subr.mxu1 %v2411_v0 }
 0x4ec   :  { %2319 = vmatpush3.msra.mxu1 %v2597_v28 }
 0x4ed   :  { %2320 = vmatprep.subr.mxu1 %v2411_v0 }
 0x4ee   :  { %2321 = vmatpush3.msra.mxu1 %v2602_v29 }
 0x4ef   :  { %2336 = vmatprep.subr.mxu1 %v2411_v0 }
 0x597   :  { %v1235_v32 = vpop.f32.mrf.mxu1 }
 0x598   :  { %v1236_v26 = vadd.f32 %v2622_v36, %v1235_v32 }
 0x599   :  { %v2258_v48 = vpop.f32.mrf.mxu1 }
 0x59f   :  { %v1380_v49 = vpop.f32.mrf.mxu1 }
 0x5a0   :  { %v1381_v50 = vadd.f32 %v1380_v49, %v1236_v26 }
 0x5a1   :  { %v2280_v51 = vpop.f32.mrf.mxu1 }
 0x5a2   :  { %v1384_v52 = vmax.f32 %v1381_v50, 0.0 }
 0x5a4   :  { %2290 = vmatmul.mubr.msk.f32.vlgmr.msra.gmra.mxu0 %vm66_vm0, %v1384_v52 }
 0x5a5   :  { %2304 = vmatpush3.msra.mxu0 %v2515_v12  ;;  %2311 = vmatprep.mubr.msk.f32.mxu0 %vm2412_vm1, %v2411_v0 }
 0x5a6   :  { %2305 = vmatprep.subr.mxu0 %v2411_v0 }
 0x5a7   :  { %2306 = vmatpush3.msra.mxu0 %v2525_v14  ;;  %v1524_v28 = vpop.f32.mrf.mxu1 }
 0x5a8   :  { %v1528_v29 = vadd.f32 %v1524_v28, %v188_v27  ;;  %2307 = vmatprep.subr.mxu0 %v2411_v0 }
 0x5a9   :  { %2308 = vmatpush3.msra.mxu0 %v2542_v17  ;;  %v2302_v53 = vpop.f32.mrf.mxu1 }
 0x5aa   :  { %v1529_v54 = vmax.f32 %v1528_v29, 0.0  ;;  %2309 = vmatprep.subr.mxu0 %v2411_v0 }
 0x5ab   :  { %2310 = vmatpush3.msra.mxu0 %v2556_v19 }
 0x5ac   :  { %2325 = vmatprep.subr.mxu0 %v2411_v0  ;;  %2312 = vmatmul.mubr.msk.f32.vlgmr.msra.gmra.mxu0 %vm66_vm0, %v1529_v54 }
 0x5ad   :  { %2326 = vmatpush3.msra.mxu0 %v2493_v8  ;;  %2333 = vmatprep.mubr.msk.f32.mxu0 %vm2412_vm1, %v2411_v0 }
 0x5ae   :  { %2327 = vmatprep.subr.mxu0 %v2411_v0 }
 0x5af   :  { %2328 = vmatpush3.msra.mxu0 %v2530_v15 }
 0x5b0   :  { %2329 = vmatprep.subr.mxu0 %v2411_v0 }
 0x5b1   :  { %2330 = vmatpush3.msra.mxu0 %v2547_v18  ;;  %v193_v18 = vadd.f32 %v2615_v34, %v2576_v22 }
 0x5b2   :  { %2331 = vmatprep.subr.mxu0 %v2411_v0 }
 0x5b3   :  { %2332 = vmatpush3.msra.mxu0 %v2561_v20 }
 0x5b4   :  { %2334 = vmatmul.mubr.msk.f32.vlgmr.msra.gmra.mxu0 %vm66_vm0, %v1529_v54  ;;  %2347 = vmatprep.subr.mxu0 %v2411_v0 }
 0x5b5   :  { %2355 = vmatprep.mubr.msk.f32.mxu0 %vm2412_vm1, %v2411_v0 }
 0x664   :  { %v1454_v8 = vpop.f32.mrf.mxu0 }
 0x665   :  { %v1455_v55 = vadd.f32 %v2622_v36, %v1454_v8 }
 0x666   :  { %v2291_v35 = vpop.f32.mrf.mxu0 }
 0x66c   :  { %v1599_v15 = vpop.f32.mrf.mxu0 }
 0x66d   :  { %v1600_v56 = vadd.f32 %v1599_v15, %v1455_v55 }
 0x66e   :  { %v2313_v57 = vpop.f32.mrf.mxu0 }
 0x66f   :  { %v1603_v58 = vmax.f32 %v1600_v56, 0.0 }
 0x671   :  { %2323 = vmatmul.mubr.msk.f32.vlgmr.msra.gmra.mxu1 %vm66_vm0, %v1603_v58 }
 0x672   :  { %2337 = vmatpush3.msra.mxu1 %v2515_v12  ;;  %2344 = vmatprep.mubr.msk.f32.mxu1 %vm2412_vm1, %v2411_v0  ;;  %v1826_v12 = vld [vmem:[%s2874_s7 + $0x18] sm:$0xff] }
 0x673   :  { %2338 = vmatprep.subr.mxu1 %v2411_v0  ;;  %2348 = vmatpush3.msra.mxu0 %v1826_v12 }
 0x674   :  { %v1743_v20 = vpop.f32.mrf.mxu0  ;;  %2339 = vmatpush3.msra.mxu1 %v2525_v14  ;;  %2349 = vmatprep.subr.mxu0 %v2411_v0  ;;  %v1825_v14 = vld [vmem:[%s2874_s7 + $0x10] sm:$0xff] }
 0x675   :  { %v1747_v59 = vadd.f32 %v1743_v20, %v193_v18  ;;  %2340 = vmatprep.subr.mxu1 %v2411_v0  ;;  %2350 = vmatpush3.msra.mxu0 %v1825_v14 }
 0x676   :  { %v2335_v60 = vpop.f32.mrf.mxu0  ;;  %2341 = vmatpush3.msra.mxu1 %v2542_v17  ;;  %2351 = vmatprep.subr.mxu0 %v2411_v0  ;;  %v1824_v17 = vld [vmem:[%s2874_s7 + $0x8] sm:$0xff] }
 0x677   :  { %v1748_v61 = vmax.f32 %v1747_v59, 0.0  ;;  %2342 = vmatprep.subr.mxu1 %v2411_v0  ;;  %2352 = vmatpush3.msra.mxu0 %v1824_v17 }
 0x678   :  { %2343 = vmatpush3.msra.mxu1 %v2556_v19  ;;  %2353 = vmatprep.subr.mxu0 %v2411_v0  ;;  %v1823_v19 = vld [vmem:[%s2874_s7] sm:$0xff]  ;;  %s2384_s7 = scalar_lea.vmem %s1916_s20, 128 }
 0x679   :  { %2345 = vmatmul.mubr.msk.f32.vlgmr.msra.gmra.mxu1 %vm66_vm0, %v1748_v61  ;;  %2354 = vmatpush3.msra.mxu0 %v1823_v19  ;;  %p2385_p5 = scmp.ne.s32.totalorder %s1916_s20, %s2384_s7  ;;  %p2390_p7 = scmp.lt.s32.totalorder %s2384_s7, %s2384_s7 }
 0x67b   :  { %p2391_p8 = por %p2390_p7, %p2389_p6 }
 0x67d   :  { %p2392_p9 = pnand %p2391_p8, %p2385_p5 }
 0x731   :  { %v1673_v22 = vpop.f32.mrf.mxu1 }
 0x732   :  { %v1674_v62 = vadd.f32 %v2622_v36, %v1673_v22 }
 0x733   :  { %v2324_v34 = vpop.f32.mrf.mxu1 }
 0x739   :  { %v1818_v63 = vpop.f32.mrf.mxu1 }
 0x73a   :  { %v1819_v1 = vadd.f32 %v1818_v63, %v1674_v62 }
 0x73b   :  { %v2346_v2 = vpop.f32.mrf.mxu1 }
 0x73c   :  { %v1822_v3 = vmax.f32 %v1819_v1, 0.0 }
 0x73e   :  { %2356 = vmatmul.mubr.msk.f32.vlgmr.msra.gmra.mxu0 %vm66_vm0, %v1822_v3 }
 0x7fe   :  { %v1903_v0 = vpop.f32.mrf.mxu0 }
 0x7ff   :  { %v1904_v5 = vadd.f32 %v1956_v4, %v1903_v0 }
 0x800   :  { %v2357_v6 = vpop.f32.mrf.mxu0 }
 0x801   :  { %1908 = vst.msk [vmem:[#allocation5] sm:$0xff] %vm1907_vm2, %v1904_v5 }
 0x802   :  { %2395 = shalt.err (!%p2392_p9)
}
 0x803   :  { %1918 = dma.vmem_to_hbm [thread:$0]  %s1916_s20, 128, %s2876_s9, [#allocation4]  }
 0x804   :  { %2406 = dma.done.wait [#allocation4], 128  }
 0x805   :  { %2407 = vsyncadd [#allocation4], 4294967168 }
 0x806   :  { %1922 = vsyncpa [#allocation3], 1 }
 0x807   :  { %1923 = vsyncpa [#allocation4], 1 }

</bundles_post_ra>
